<compile_context>
chip_gen: v5e
topology: v5e:2x2
jax: 0.10.0
libtpu: 0.0.40
codegen_flags: <defaults>
</compile_context>

<pallas_src>
import functools

import jax
import jax.numpy as jnp
from jax import lax
from jax.experimental import pallas as pl
from jax.experimental.pallas import tpu as pltpu

_LANE = 128
_SUB = 8
_F32_MAX = float(jnp.finfo(jnp.float32).max)


def _round_up(a, b):
    return (a + b - 1) // b * b


def _vmem_budget():
    # ~3/8 of physical VMEM, capped at 32 MiB: 24 MiB on v7x (64 MiB / TC),
    # 32 MiB on v5e / v6e (128 MiB).  Falls back to the v7x-safe value.
    try:
        cap = int(pltpu.get_tpu_info().vmem_capacity_bytes)
    except Exception:
        cap = 64 << 20
    return max(16 << 20, min(32 << 20, (cap * 3) // 8))


def _vmem_limit_bytes(estimate):
    return int(min(40 << 20, max(16 << 20, estimate + (4 << 20))))


def _tiles(N, oD, D, k, s, fused):
    """Pick (TN, g_n, To, g_o, per_row_bytes)."""
    budget = _vmem_budget()

    # Lane (output-position) tile: a multiple of 128 whenever oD allows it so
    # the kernel's stores stay lane-dense; ragged last blocks are left to the
    # Pallas partial-block DMA instead of a pad / slice pass.
    if oD >= _LANE:
        g_o = pl.cdiv(oD, 2048)
        To = min(_round_up(pl.cdiv(oD, g_o), _LANE), (oD // _LANE) * _LANE)
        g_o = pl.cdiv(oD, To)
    else:
        g_o, To = 1, oD

    # Live (TN, To) f32 temporaries inside the fused kernel body.
    temp_tiles = (k + 4) if k <= 4 else 7

    def row_tile(to_, g_o_):
        if fused:
            w = D if g_o_ == 1 else to_ * s
        else:
            w = k * to_
        per_row = 4 * (2 * (w + to_) + temp_tiles * to_)
        cap = max(_SUB, min(1024, (budget // per_row) // _SUB * _SUB))
        if N <= cap:
            return N, 1, per_row
        g_n_ = pl.cdiv(N, cap)
        tn_ = _round_up(pl.cdiv(N, g_n_), _SUB)
        return tn_, pl.cdiv(N, tn_), per_row

    TN, g_n, per_row = row_tile(To, g_o)

    # v7x has 2 TensorCores: make sure a "parallel" axis has >= 2 blocks when
    # the problem is big enough to split (no effect on v5e / v6e).
    if g_n * g_o == 1:
        if N >= 2 * _SUB:
            TN = _round_up(pl.cdiv(N, 2), _SUB)
            g_n = pl.cdiv(N, TN)
        elif oD >= 2 * _LANE:
            To = _round_up(pl.cdiv(oD, 2), _LANE)
            g_o = pl.cdiv(oD, To)
            TN, g_n, per_row = row_tile(To, g_o)

    return TN, g_n, To, g_o, per_row


def _idw_accumulate(get_x, k, o_ref):
    """Shared IDW math.  get_x(i) -> the i-th window-offset slab, (TN, To) f32."""
    if k <= 4:
        xk = [get_x(i) for i in range(k)]            # <= 4 live tiles
        if k == 1:
            d2 = [jnp.zeros_like(xk[0])]
        else:
            # Exact pairwise squared distances (matches the CUDA math); each
            # (x_i - x_j)^2 is computed once and shared between d2[i] and d2[j].
            d2 = [None] * k
            for i in range(k):
                for j in range(i + 1, k):
                    dif = xk[i] - xk[j]
                    sq = dif * dif
                    d2[i] = sq if d2[i] is None else d2[i] + sq
                    d2[j] = sq if d2[j] is None else d2[j] + sq
        num = None
        den = None
        for i in range(k):
            inv = lax.rsqrt(d2[i])                    # 1/dist_i; rsqrt(0) = +inf
            num = inv * xk[i] if num is None else num + inv * xk[i]
            den = inv if den is None else den + inv
    else:
        # Centered expansion: sum_{j!=i}(x_i - x_j)^2 == k*c_i^2 + sum_j c_j^2,
        # c = x - mean.  Slabs are re-read from the resident VMEM block instead
        # of kept live, so only ~6 full tiles are alive regardless of k.
        mean = get_x(0)
        for i in range(1, k):
            mean = mean + get_x(i)
        mean = mean * jnp.float32(1.0 / k)
        ssq = None
        for i in range(k):
            c = get_x(i) - mean
            ssq = c * c if ssq is None else ssq + c * c
        kf = jnp.float32(k)
        num = None
        den = None
        for i in range(k):
            xi = get_x(i)
            c = xi - mean
            inv = lax.rsqrt(kf * (c * c) + ssq)
            num = inv * xi if num is None else num + inv * xi
            den = inv if den is None else den + inv

    # CUDA: clamp(sum_k 1/dist_k, 0, f32_max); a single divide per output.
    den = jnp.clip(den, 0.0, jnp.float32(_F32_MAX))
    out = num / den
    # torch.nan_to_num: nan -> 0, +inf -> f32 max, -inf -> f32 min.
    o_ref[...] = jnp.nan_to_num(out).astype(o_ref.dtype)


def _idw_kernel_fused(x_ref, o_ref, *, k, s, to):
    """x_ref: (TN, W) raw input columns; de-interleave in VMEM with strided loads."""
    def get_x(i):
        if s == 1:
            return x_ref[:, pl.ds(i, to)]
        return x_ref[:, pl.ds(i, to, stride=s)]
    _idw_accumulate(get_x, k, o_ref)


def _idw_kernel_stacked(xs_ref, o_ref, *, k):
    """xs_ref: (K, TN, To) pre-de-interleaved window slabs."""
    def get_x(i):
        return xs_ref[i]
    _idw_accumulate(get_x, k, o_ref)


@functools.partial(jax.jit, static_argnums=(1, 2))
def _idwpool_fused(x, k, s):
    x = x.astype(jnp.float32)
    B, C, D = x.shape
    N = B * C
    oD = (D - k) // s + 1
    x2 = x.reshape(N, D)                               # metadata-only reshape

    TN, g_n, To, g_o, per_row = _tiles(N, oD, D, k, s, fused=True)
    if g_o == 1:
        in_spec = pl.BlockSpec((TN, D), lambda i, j: (i, 0))
    else:
        in_spec = pl.BlockSpec((TN, To * s), lambda i, j: (i, j))

    out = pl.pallas_call(
        functools.partial(_idw_kernel_fused, k=k, s=s, to=To),
        out_shape=jax.ShapeDtypeStruct((N, oD), jnp.float32),
        grid_spec=pltpu.PrefetchScalarGridSpec(
            num_scalar_prefetch=0,
            grid=(g_n, g_o),
            in_specs=[in_spec],
            out_specs=pl.BlockSpec((TN, To), lambda i, j: (i, j)),
        ),
        compiler_params=pltpu.CompilerParams(
            dimension_semantics=("parallel", "parallel"),
            vmem_limit_bytes=_vmem_limit_bytes(per_row * TN),
        ),
    )(x2)
    return out.reshape(B, C, oD)


@functools.partial(jax.jit, static_argnums=(1, 2))
def _idwpool_stacked(x, k, s):
    x = x.astype(jnp.float32)
    B, C, D = x.shape
    N = B * C
    oD = (D - k) // s + 1
    x2 = x.reshape(N, D)
    span = (oD - 1) * s + 1
    # One XLA pass: de-interleave the K window slabs (needed for overlapping
    # windows, i.e. stride < kernel, or if the fused path is unavailable).
    xs = jnp.stack([x2[:, kk:kk + span:s] for kk in range(k)], axis=0)  # (K,N,oD)

    TN, g_n, To, g_o, per_row = _tiles(N, oD, D, k, s, fused=False)

    out = pl.pallas_call(
        functools.partial(_idw_kernel_stacked, k=k),
        out_shape=jax.ShapeDtypeStruct((N, oD), jnp.float32),
        grid_spec=pltpu.PrefetchScalarGridSpec(
            num_scalar_prefetch=0,
            grid=(g_n, g_o),
            in_specs=[pl.BlockSpec((k, TN, To), lambda i, j: (0, i, j))],
            out_specs=pl.BlockSpec((TN, To), lambda i, j: (i, j)),
        ),
        compiler_params=pltpu.CompilerParams(
            dimension_semantics=("parallel", "parallel"),
            vmem_limit_bytes=_vmem_limit_bytes(per_row * TN),
        ),
    )(xs)
    return out.reshape(B, C, oD)


def _idwpool1d_ref(x, kernel_size=2, stride=None):
    """Pure-JAX reference of the same CUDA semantics (used for validation)."""
    if stride is None:
        stride = kernel_size
    k, s = int(kernel_size), int(stride)
    x = jnp.asarray(x, jnp.float32)
    D = x.shape[-1]
    oD = (D - k) // s + 1
    idx = (jnp.arange(oD) * s)[:, None] + jnp.arange(k)[None, :]
    xw = x[..., idx]                                   # (..., oD, K)
    diff = xw[..., :, None] - xw[..., None, :]         # (..., oD, K, K)
    dist = jnp.sqrt(jnp.sum(diff * diff, axis=-1))     # (..., oD, K)
    inv = 1.0 / dist
    den = jnp.clip(jnp.sum(inv, axis=-1, keepdims=True), 0.0, _F32_MAX)
    return jnp.nan_to_num(jnp.sum((inv / den) * xw, axis=-1))


_FUSED_OK = {}


def _fused_path_ok(k, s):
    """Validate the strided-load fused path once per (k, s); any compile error
    or numeric mismatch silently routes traffic to the stacked path."""
    key = (k, s)
    if key not in _FUSED_OK:
        ok = True
        try:
            probe_key = jax.random.PRNGKey(1234)
            for d in (s * 13 + k + 1, s * 2200 + k + 3):
                xp = jax.random.normal(probe_key, (1, 11, d), dtype=jnp.float32)
                got = jax.block_until_ready(_idwpool_fused(xp, k, s))
                want = _idwpool1d_ref(xp, k, s)
                if not bool(jnp.allclose(got, want, atol=1e-5, rtol=1e-4)):
                    ok = False
                    break
        except Exception:
            ok = False
        _FUSED_OK[key] = ok
    return _FUSED_OK[key]


def idwpool1d(x, kernel_size=2, stride=None, return_mask=False):
    """JAX/Pallas equivalent of adaPool's idwpool1d forward (NCW layout)."""
    if return_mask:
        # TODO(synk): return_mask (per-window IDW weight mask) not implemented.
        raise NotImplementedError("return_mask=True is not supported")
    if isinstance(kernel_size, (tuple, list)):
        kernel_size = kernel_size[0]
    if stride is None:
        stride = kernel_size
    if isinstance(stride, (tuple, list)):
        stride = stride[0]
    k, s = int(kernel_size), int(stride)

    no_batch = (x.ndim == 2)
    if no_batch:
        x = x[None]

    # Fused path: non-overlapping / gapped windows (s >= k), gap not so wide
    # that reading the raw rows wastes bandwidth, and the in-VMEM strided
    # de-interleave verified to lower and match on this toolchain.
    if k <= s <= 3 * k and _fused_path_ok(k, s):
        try:
            out = _idwpool_fused(x, k, s)
        except Exception:
            out = _idwpool_stacked(x, k, s)
    else:
        out = _idwpool_stacked(x, k, s)
    return out[0] if no_batch else out


class IDWPool1d:
    """Module-style wrapper matching the PyTorch IDWPool1d forward."""

    def __init__(self, kernel_size=2, stride=None, return_mask=False):
        if stride is None:
            stride = kernel_size
        self.kernel_size = kernel_size
        self.stride = stride
        self.return_mask = return_mask

    def __call__(self, x):
        return idwpool1d(x, kernel_size=self.kernel_size, stride=self.stride,
                         return_mask=self.return_mask)


if __name__ == "__main__":
    key = jax.random.PRNGKey(0)

    # Primary shape implied by the module (NCW): batch=2, channels=4, width=16.
    B, C, D = 2, 4, 16
    x = jax.random.normal(key, (B, C, D), dtype=jnp.float32)
    pool = IDWPool1d(kernel_size=2)
    out = jax.block_until_ready(pool(x))
    ref = _idwpool1d_ref(x, kernel_size=2)
    assert out.shape == (B, C, (D - 2) // 2 + 1)
    assert jnp.allclose(out, ref, atol=1e-5, rtol=1e-4), "mismatch (k=2, s=2)"

    # Second config: overlapping windows (stride < kernel) exercising the
    # stacked fallback path, with rows not a multiple of 8.
    key2, _ = jax.random.split(key)
    x2 = jax.random.normal(key2, (1, 3, 20), dtype=jnp.float32)
    out2 = jax.block_until_ready(idwpool1d(x2, kernel_size=3, stride=2))
    ref2 = _idwpool1d_ref(x2, kernel_size=3, stride=2)
    assert out2.shape == (1, 3, (20 - 3) // 2 + 1)
    assert jnp.allclose(out2, ref2, atol=1e-5, rtol=1e-4), "mismatch (k=3, s=2)"

    print("KERNEL_OK")
</pallas_src>

<mosaic_0001>
module attributes {stable_mosaic.version = 11 : i64} {
  func.func @_idw_kernel_fused(%arg0: i32, %arg1: i32, %arg2: memref<11x29xf32, #tpu.memory_space<vmem>>, %arg3: memref<11x14xf32, #tpu.memory_space<vmem>>) attributes {dimension_semantics = [#tpu.dimension_semantics<parallel>, #tpu.dimension_semantics<parallel>], iteration_bounds = array<i64: 1, 1>, scalar_prefetch = 0 : i64, scratch_operands = 0 : i64, tpu.core_type = #tpu.core_type<tc>, window_params = [{transform_indices = @transform_0, window_bounds = array<i64: 11, 29>}, {transform_indices = @transform_1, window_bounds = array<i64: 11, 14>}]} {
    %c0 = arith.constant 0 : index
    %c0_0 = arith.constant 0 : index
    %0 = tpu.strided_load %arg2[%c0, %c0_0] {strides = array<i32: 1, 2>} : memref<11x29xf32, #tpu.memory_space<vmem>>, vector<11x14xf32>
    %c0_1 = arith.constant 0 : index
    %c1 = arith.constant 1 : index
    %1 = tpu.strided_load %arg2[%c0_1, %c1] {strides = array<i32: 1, 2>} : memref<11x29xf32, #tpu.memory_space<vmem>>, vector<11x14xf32>
    %2 = arith.subf %0, %1 : vector<11x14xf32>
    %3 = arith.mulf %2, %2 : vector<11x14xf32>
    %4 = math.rsqrt %3 : vector<11x14xf32>
    %5 = arith.mulf %4, %0 : vector<11x14xf32>
    %6 = math.rsqrt %3 : vector<11x14xf32>
    %7 = arith.mulf %6, %1 : vector<11x14xf32>
    %8 = arith.addf %5, %7 : vector<11x14xf32>
    %9 = arith.addf %4, %6 : vector<11x14xf32>
    %cst = arith.constant 0.000000e+00 : f32
    %cst_2 = arith.constant 3.40282347E+38 : f32
    %10 = vector.broadcast %cst : f32 to vector<11x14xf32>
    %11 = arith.maximumf %10, %9 : vector<11x14xf32>
    %12 = vector.broadcast %cst_2 : f32 to vector<11x14xf32>
    %13 = arith.minimumf %12, %11 : vector<11x14xf32>
    %14 = arith.divf %8, %13 : vector<11x14xf32>
    %15 = arith.cmpf one, %14, %14 : vector<11x14xf32>
    %cst_3 = arith.constant 0.000000e+00 : f32
    %16 = vector.broadcast %cst_3 : f32 to vector<11x14xf32>
    %17 = arith.select %15, %16, %14 : vector<11x14xi1>, vector<11x14xf32>
    %cst_4 = arith.constant 0x7F800000 : f32
    %18 = vector.broadcast %cst_4 : f32 to vector<11x14xf32>
    %19 = arith.cmpf oeq, %17, %18 : vector<11x14xf32>
    %cst_5 = arith.constant 3.40282347E+38 : f32
    %20 = vector.broadcast %cst_5 : f32 to vector<11x14xf32>
    %21 = arith.select %19, %20, %17 : vector<11x14xi1>, vector<11x14xf32>
    %cst_6 = arith.constant 0xFF800000 : f32
    %22 = vector.broadcast %cst_6 : f32 to vector<11x14xf32>
    %23 = arith.cmpf oeq, %21, %22 : vector<11x14xf32>
    %cst_7 = arith.constant -3.40282347E+38 : f32
    %24 = vector.broadcast %cst_7 : f32 to vector<11x14xf32>
    %25 = arith.select %23, %24, %21 : vector<11x14xi1>, vector<11x14xf32>
    %c0_8 = arith.constant 0 : index
    %c0_9 = arith.constant 0 : index
    %26 = vector.load %arg3[%c0_8, %c0_9] : memref<11x14xf32, #tpu.memory_space<vmem>>, vector<11x14xf32>
    tpu.vector_store %arg3[%c0_8, %c0_9], %25 {strides = array<i32>} : memref<11x14xf32, #tpu.memory_space<vmem>>, vector<11x14xf32>,
    return
  }
  func.func @transform_0(%arg0: i32, %arg1: i32) -> (i32, i32) {
    %c0_i32 = arith.constant 0 : i32
    %c0_i32_0 = arith.constant 0 : i32
    return %arg0, %c0_i32 : i32, i32
  }
  func.func @transform_1(%arg0: i32, %arg1: i32) -> (i32, i32) {
    %c0_i32 = arith.constant 0 : i32
    return %arg0, %arg1 : i32, i32
  }
}

module attributes {stable_mosaic.version = 11 : i64} {
  func.func @_idw_kernel_stacked(%arg0: i32, %arg1: i32, %arg2: memref<2x8x8xf32, #tpu.memory_space<vmem>>, %arg3: memref<8x8xf32, #tpu.memory_space<vmem>>) attributes {dimension_semantics = [#tpu.dimension_semantics<parallel>, #tpu.dimension_semantics<parallel>], iteration_bounds = array<i64: 1, 1>, scalar_prefetch = 0 : i64, scratch_operands = 0 : i64, tpu.core_type = #tpu.core_type<tc>, window_params = [{transform_indices = @transform_0, window_bounds = array<i64: 2, 8, 8>}, {transform_indices = @transform_1, window_bounds = array<i64: 8, 8>}]} {
    %c0 = arith.constant 0 : index
    %c0_0 = arith.constant 0 : index
    %c0_1 = arith.constant 0 : index
    %0 = vector.load %arg2[%c0, %c0_0, %c0_1] : memref<2x8x8xf32, #tpu.memory_space<vmem>>, vector<1x8x8xf32>
    %1 = vector.shape_cast %0 : vector<1x8x8xf32> to vector<8x8xf32>
    %c1 = arith.constant 1 : index
    %c0_2 = arith.constant 0 : index
    %c0_3 = arith.constant 0 : index
    %2 = vector.load %arg2[%c1, %c0_2, %c0_3] : memref<2x8x8xf32, #tpu.memory_space<vmem>>, vector<1x8x8xf32>
    %3 = vector.shape_cast %2 : vector<1x8x8xf32> to vector<8x8xf32>
    %4 = arith.subf %1, %3 : vector<8x8xf32>
    %5 = arith.mulf %4, %4 : vector<8x8xf32>
    %6 = math.rsqrt %5 : vector<8x8xf32>
    %7 = arith.mulf %6, %1 : vector<8x8xf32>
    %8 = math.rsqrt %5 : vector<8x8xf32>
    %9 = arith.mulf %8, %3 : vector<8x8xf32>
    %10 = arith.addf %7, %9 : vector<8x8xf32>
    %11 = arith.addf %6, %8 : vector<8x8xf32>
    %cst = arith.constant 0.000000e+00 : f32
    %cst_4 = arith.constant 3.40282347E+38 : f32
    %12 = vector.broadcast %cst : f32 to vector<8x8xf32>
    %13 = arith.maximumf %12, %11 : vector<8x8xf32>
    %14 = vector.broadcast %cst_4 : f32 to vector<8x8xf32>
    %15 = arith.minimumf %14, %13 : vector<8x8xf32>
    %16 = arith.divf %10, %15 : vector<8x8xf32>
    %17 = arith.cmpf one, %16, %16 : vector<8x8xf32>
    %cst_5 = arith.constant 0.000000e+00 : f32
    %18 = vector.broadcast %cst_5 : f32 to vector<8x8xf32>
    %19 = arith.select %17, %18, %16 : vector<8x8xi1>, vector<8x8xf32>
    %cst_6 = arith.constant 0x7F800000 : f32
    %20 = vector.broadcast %cst_6 : f32 to vector<8x8xf32>
    %21 = arith.cmpf oeq, %19, %20 : vector<8x8xf32>
    %cst_7 = arith.constant 3.40282347E+38 : f32
    %22 = vector.broadcast %cst_7 : f32 to vector<8x8xf32>
    %23 = arith.select %21, %22, %19 : vector<8x8xi1>, vector<8x8xf32>
    %cst_8 = arith.constant 0xFF800000 : f32
    %24 = vector.broadcast %cst_8 : f32 to vector<8x8xf32>
    %25 = arith.cmpf oeq, %23, %24 : vector<8x8xf32>
    %cst_9 = arith.constant -3.40282347E+38 : f32
    %26 = vector.broadcast %cst_9 : f32 to vector<8x8xf32>
    %27 = arith.select %25, %26, %23 : vector<8x8xi1>, vector<8x8xf32>
    %c0_10 = arith.constant 0 : index
    %c0_11 = arith.constant 0 : index
    %28 = vector.load %arg3[%c0_10, %c0_11] : memref<8x8xf32, #tpu.memory_space<vmem>>, vector<8x8xf32>
    tpu.vector_store %arg3[%c0_10, %c0_11], %27 {strides = array<i32>} : memref<8x8xf32, #tpu.memory_space<vmem>>, vector<8x8xf32>,
    return
  }
  func.func @transform_0(%arg0: i32, %arg1: i32) -> (i32, i32, i32) {
    %c0_i32 = arith.constant 0 : i32
    %c0_i32_0 = arith.constant 0 : i32
    return %c0_i32, %arg0, %arg1 : i32, i32, i32
  }
  func.func @transform_1(%arg0: i32, %arg1: i32) -> (i32, i32) {
    %c0_i32 = arith.constant 0 : i32
    return %arg0, %arg1 : i32, i32
  }
}

</mosaic_0001>

<bundles_post_ra>
// kernel: _idwpool_stacked.1
= control target key start
LH: loop header
LB: loop body
LE: loop exit
PB: predicated region body
PF: predicated region fallthrough
CT: control target
= control target key end

     0   :  { %s121_s0 = inlined_call_operand.vmem [shape: f32[2,8,8], index: 0, kind: input, shape index: {}]   ;;  %s122_s1 = inlined_call_operand.hbm [shape: f32[8,8], index: 1, kind: output, shape index: {}]  }
   0x1   :  { %v9_v0 = vld [vmem:[%s121_s0] sm:$0xff]  ;;  %v69_v1 = vld [vmem:[%s121_s0 + $0x8] sm:$0xff] }
   0x2   :  { %6 = vsyncpa [#allocation3], 0  ;;  %v12_v2 = vsub.f32 %v9_v0, %v69_v1  ;;  %s101_s0 = smov [#allocation2]   ;;  %s60_s13 = sshll.u32 %s122_s1, 4  ;;  %vm51_vm9 = vcmask 64512   ;;  %s61_s13 = int_to_ptr.hbm [resolvable:$true] %s60_s13 }
   0x3   :  { %s58_s10 = sshll.u32 %s101_s0, 4  ;;  %s59_s10 = int_to_ptr.vmem [resolvable:$true] %s58_s10 }
   0x4   :  { %v13_v3 = vmul.f32 %v12_v2, %v12_v2 }
   0x6   :  { %71 = vrsqrt.f32 %v13_v3  ;;  %vm20_vm0 = vweird.f32 %v13_v3 }
   0xc   :  { %v72_v4 = vpop.eup %71 }
   0xd   :  { %v15_v5 = vmul.f32 %v72_v4, %v13_v3  ;;  %vm21_vm1 = vweird.f32 %v72_v4 }
   0xe   :  { %vm22_vm2 = vmor %vm20_vm0, %vm21_vm1 }
   0xf   :  { %v16_v6 = vmul.f32 %v72_v4, %v15_v5 }
  0x11   :  { %v17_v7 = vmul.f32 0.5, %v16_v6 }
  0x13   :  { %v18_v8 = vsub.f32 1.5, %v17_v7 }
  0x15   :  { %v19_v9 = vmul.f32 %v72_v4, %v18_v8 }
  0x17   :  { %v23_v10 = vsel %vm22_vm2, %v72_v4, %v19_v9 }
  0x18   :  { %v27_v11 = vadd.f32 %v23_v10, %v23_v10  ;;  %v24_v16 = vmul.f32 %v23_v10, %v9_v0  ;;  %v25_v17 = vmul.f32 %v69_v1, %v23_v10 }
  0x1a   :  { %v28_v12 = vmax.f32 %v27_v11, 0.0  ;;  %v26_v23 = vadd.f32 %v25_v17, %v24_v16 }
  0x1c   :  { %v29_v13 = vmin.f32 %v28_v12, 3.4028235e+38 }
  0x1e   :  { %73 = vrcp.f32 %v29_v13  ;;  %v41_v18 = vand.u32 2147483648, %v29_v13  ;;  %vm35_vm3 = vweird.f32 %v29_v13  ;;  %v39_v20 = vand.u32 2147483647, %v29_v13 }
  0x20   :  { %v42_v22 = vor.u32 1.1754944e-38, %v41_v18  ;;  %vm40_vm6 = vcmp.eq.f32.partialorder %v39_v20, 8.507059e+37 }
  0x24   :  { %v74_v14 = vpop.eup %73 }
  0x25   :  { %v31_v15 = vmul.f32 %v74_v14, %v29_v13  ;;  %vm36_vm4 = vweird.f32 %v74_v14 }
  0x26   :  { %vm37_vm5 = vmor %vm35_vm3, %vm36_vm4 }
  0x27   :  { %v32_v19 = vsub.f32 1.0, %v31_v15 }
  0x29   :  { %v33_v21 = vmul.f32 %v74_v14, %v32_v19 }
  0x2b   :  { %v34_v24 = vadd.f32 %v74_v14, %v33_v21 }
  0x2d   :  { %v38_v25 = vsel %vm37_vm5, %v74_v14, %v34_v24 }
  0x2e   :  { %v43_v26 = vsel %vm40_vm6, %v42_v22, %v38_v25 }
  0x2f   :  { %v44_v27 = vmul.f32 %v43_v26, %v26_v23 }
  0x31   :  { %vm45_vm7 = vcmp.ne.f32.partialorder %v44_v27, %v44_v27 }
  0x32   :  { %v46_v28 = vsel %vm45_vm7, 0.0, %v44_v27 }
  0x33   :  { %vm47_vm8 = vcmp.eq.f32.partialorder %v46_v28, inf }
  0x34   :  { %v48_v29 = vsel %vm47_vm8, 3.4028235e+38, %v46_v28 }
  0x35   :  { %vm49_vm10 = vcmp.eq.f32.partialorder %v48_v29, -inf }
  0x36   :  { %v50_v30 = vsel %vm49_vm10, -3.4028235e+38, %v48_v29 }
  0x37   :  { %52 = vst.msk [vmem:[#allocation2] sm:$0xff] %vm51_vm9, %v50_v30 }
  0x38   :  { %63 = dma.vmem_to_hbm [thread:$0]  %s59_s10, 128, %s61_s13, [#allocation3]  }
  0x39   :  { %99 = dma.done.wait [#allocation3], 128  }
  0x3a   :  { %100 = vsyncadd [#allocation3], 4294967168 }
  0x3b   :  { %68 = vsyncpa [#allocation3], 1 }

</bundles_post_ra>
